<compile_context>
chip_gen: v7x
topology: tpu7x:2x2x1
jax: 0.10.0
libtpu: 0.0.40
codegen_flags: <defaults>
</compile_context>

<pallas_src>
from functools import partial

import jax
import jax.numpy as jnp
from jax.experimental import pallas as pl
from jax.experimental.pallas import tpu as pltpu

_INV_SQRT2 = 0.7071067811865476  # 1/sqrt(2)
_LANE = 128
_SUBLANE = 8


def _gelu_exact(y):
    # PyTorch nn.GELU() default is the exact erf-based GELU.
    return 0.5 * y * (1.0 + jax.lax.erf(y * _INV_SQRT2))


# --------------------------- fused MLP kernel ---------------------------------


def _mlp_fused_kernel(x_ref, w_ref, b_ref, o_ref, *, num_layers):
    """Runs every layer of the MLP on one (TILE_B, Dp) activation tile.

    x_ref: (TILE_B, Dp)        input tile (zero padded on the lane axis)
    w_ref: (L, Dp, Dp)         pre-transposed, zero-padded weights (y = x @ W)
    b_ref: (L, 1, Dp)          zero-padded biases
    o_ref: (TILE_B, Dp)        output tile (padding lanes are zero)
    """
    h = x_ref[...]

    # layer 0: gelu(linear)
    y = jnp.dot(h, w_ref[0], preferred_element_type=jnp.float32) + b_ref[0]
    h = _gelu_exact(y)

    # middle layers: residual + gelu  (unrolled; activations stay in vregs/VMEM)
    for l in range(1, num_layers - 1):
        y = jnp.dot(h, w_ref[l], preferred_element_type=jnp.float32) + b_ref[l]
        h = h + _gelu_exact(y)

    # last layer: plain linear
    o_ref[...] = (
        jnp.dot(h, w_ref[num_layers - 1], preferred_element_type=jnp.float32)
        + b_ref[num_layers - 1]
    )


def _round_up(n, m):
    return ((n + m - 1) // m) * m


def _pick_batch_tile(bp):
    for t in (512, 256, 128, 64, 32, 16, 8):
        if bp % t == 0:
            return t
    return bp


def mlp_forward_pallas(x, layer_params):
    """Fused MLP forward. layer_params: list of (w[in,out], b[out]) in f32."""
    num_layers = len(layer_params)
    B, Din = x.shape
    Dout = layer_params[-1][0].shape[1]

    dmax = max(Din, Dout, *(max(w.shape) for w, _ in layer_params))
    Dp = _round_up(dmax, _LANE)
    Bp = _round_up(B, _SUBLANE)
    tile_b = _pick_batch_tile(Bp)

    # Stack zero-padded weights/biases into single VMEM-resident arrays.
    w_stack = jnp.stack(
        [jnp.pad(w, ((0, Dp - w.shape[0]), (0, Dp - w.shape[1]))) for w, _ in layer_params]
    )  # (L, Dp, Dp)
    b_stack = jnp.stack(
        [jnp.pad(b, (0, Dp - b.shape[0])).reshape(1, Dp) for _, b in layer_params]
    )  # (L, 1, Dp)
    x_p = jnp.pad(x, ((0, Bp - B), (0, Dp - Din)))

    out = pl.pallas_call(
        partial(_mlp_fused_kernel, num_layers=num_layers),
        out_shape=jax.ShapeDtypeStruct((Bp, Dp), jnp.float32),
        grid=(Bp // tile_b,),
        in_specs=[
            pl.BlockSpec((tile_b, Dp), lambda i: (i, 0)),
            pl.BlockSpec((num_layers, Dp, Dp), lambda i: (0, 0, 0)),
            pl.BlockSpec((num_layers, 1, Dp), lambda i: (0, 0, 0)),
        ],
        out_specs=pl.BlockSpec((tile_b, Dp), lambda i: (i, 0)),
        compiler_params=pltpu.CompilerParams(
            dimension_semantics=("parallel",),  # shard batch tiles across TCs on v7x
        ),
    )(x_p, w_stack, b_stack)

    return out[:B, :Dout]


# --------------------------- params / reference --------------------------------


def make_linear_params(key, dim_in, dim_out):
    # Deterministic init mimicking nn.Linear (uniform in +-1/sqrt(fan_in)),
    # stored pre-transposed as [in, out] so y = x @ W + b.
    kw, kb = jax.random.split(key)
    bound = 1.0 / jnp.sqrt(jnp.float32(dim_in))
    w = jax.random.uniform(kw, (dim_in, dim_out), jnp.float32, -bound, bound)
    b = jax.random.uniform(kb, (dim_out,), jnp.float32, -bound, bound)
    return w, b


def make_mlp_params(key, dim_in, dim_hidden, dim_out, num_layer):
    dims = [(dim_in, dim_hidden)] + [(dim_hidden, dim_hidden)] * num_layer + [(dim_hidden, dim_out)]
    keys = jax.random.split(key, len(dims))
    return [make_linear_params(k, di, do) for k, (di, do) in zip(keys, dims)]


def mlp_reference(x, layer_params):
    """Pure-JAX reference matching MLP.forward exactly."""
    n = len(layer_params)
    for idx, (w, b) in enumerate(layer_params):
        if idx == 0:
            x = _gelu_exact(x @ w + b)
        elif idx == n - 1:
            x = x @ w + b
        else:
            x = x + _gelu_exact(x @ w + b)
    return x


if __name__ == "__main__":
    dim_in, dim_hidden, dim_out, num_layer = 16, 32, 16, 2
    batch = 8

    key = jax.random.PRNGKey(0)
    k_params, k_x = jax.random.split(key)

    params = make_mlp_params(k_params, dim_in, dim_hidden, dim_out, num_layer)
    x = jax.random.normal(k_x, (batch, dim_in), dtype=jnp.float32)

    fwd = jax.jit(mlp_forward_pallas)
    out = fwd(x, params)
    jax.block_until_ready(out)

    ref = mlp_reference(x, params)
    assert out.shape == (batch, dim_out)
    assert bool(jnp.allclose(out, ref, atol=1e-5, rtol=1e-5)), "mismatch vs reference"

    print("KERNEL_OK")
</pallas_src>

<mosaic_0001>
module attributes {stable_mosaic.version = 11 : i64} {
  func.func @_mlp_fused_kernel(%arg0: i32, %arg1: memref<8x128xf32, #tpu.memory_space<vmem>>, %arg2: memref<4x128x128xf32, #tpu.memory_space<vmem>>, %arg3: memref<4x1x128xf32, #tpu.memory_space<vmem>>, %arg4: memref<8x128xf32, #tpu.memory_space<vmem>>) attributes {dimension_semantics = [#tpu.dimension_semantics<parallel>], iteration_bounds = array<i64: 1>, scalar_prefetch = 0 : i64, scratch_operands = 0 : i64, tpu.core_type = #tpu.core_type<tc>, window_params = [{transform_indices = @transform_0, window_bounds = array<i64: 8, 128>}, {pipeline_mode = #tpu.pipeline_mode<synchronous>, transform_indices = @transform_1, window_bounds = array<i64: 4, 128, 128>}, {pipeline_mode = #tpu.pipeline_mode<synchronous>, transform_indices = @transform_2, window_bounds = array<i64: 4, 1, 128>}, {transform_indices = @transform_3, window_bounds = array<i64: 8, 128>}]} {
    %c0 = arith.constant 0 : index
    %c0_0 = arith.constant 0 : index
    %0 = vector.load %arg1[%c0, %c0_0] : memref<8x128xf32, #tpu.memory_space<vmem>>, vector<8x128xf32>
    %c0_1 = arith.constant 0 : index
    %c0_2 = arith.constant 0 : index
    %c0_3 = arith.constant 0 : index
    %1 = vector.load %arg2[%c0_1, %c0_2, %c0_3] : memref<4x128x128xf32, #tpu.memory_space<vmem>>, vector<1x128x128xf32>
    %2 = vector.shape_cast %1 : vector<1x128x128xf32> to vector<128x128xf32>
    %cst = arith.constant dense<0.000000e+00> : vector<8x128xf32>
    %3 = tpu.matmul %0, %2, %cst {dimension_numbers = #tpu.dot_dimension_numbers<[1], [0], [0], [1], [0, 0, 1, 1], [], []>} : vector<8x128xf32>, vector<128x128xf32>, vector<8x128xf32> -> vector<8x128xf32>
    %c0_4 = arith.constant 0 : index
    %c0_5 = arith.constant 0 : index
    %c0_6 = arith.constant 0 : index
    %4 = vector.load %arg3[%c0_4, %c0_5, %c0_6] : memref<4x1x128xf32, #tpu.memory_space<vmem>>, vector<1x1x128xf32>
    %5 = vector.shape_cast %4 : vector<1x1x128xf32> to vector<1x128xf32>
    %6 = vector.broadcast %5 : vector<1x128xf32> to vector<8x128xf32>
    %7 = arith.addf %3, %6 : vector<8x128xf32>
    %cst_7 = arith.constant 5.000000e-01 : f32
    %8 = vector.broadcast %cst_7 : f32 to vector<8x128xf32>
    %9 = arith.mulf %8, %7 : vector<8x128xf32>
    %cst_8 = arith.constant 0.707106769 : f32
    %10 = vector.broadcast %cst_8 : f32 to vector<8x128xf32>
    %11 = arith.mulf %7, %10 : vector<8x128xf32>
    %12 = math.erf %11 : vector<8x128xf32>
    %cst_9 = arith.constant 1.000000e+00 : f32
    %13 = vector.broadcast %cst_9 : f32 to vector<8x128xf32>
    %14 = arith.addf %13, %12 : vector<8x128xf32>
    %15 = arith.mulf %9, %14 : vector<8x128xf32>
    %c1 = arith.constant 1 : index
    %c0_10 = arith.constant 0 : index
    %c0_11 = arith.constant 0 : index
    %16 = vector.load %arg2[%c1, %c0_10, %c0_11] : memref<4x128x128xf32, #tpu.memory_space<vmem>>, vector<1x128x128xf32>
    %17 = vector.shape_cast %16 : vector<1x128x128xf32> to vector<128x128xf32>
    %cst_12 = arith.constant dense<0.000000e+00> : vector<8x128xf32>
    %18 = tpu.matmul %15, %17, %cst_12 {dimension_numbers = #tpu.dot_dimension_numbers<[1], [0], [0], [1], [0, 0, 1, 1], [], []>} : vector<8x128xf32>, vector<128x128xf32>, vector<8x128xf32> -> vector<8x128xf32>
    %c1_13 = arith.constant 1 : index
    %c0_14 = arith.constant 0 : index
    %c0_15 = arith.constant 0 : index
    %19 = vector.load %arg3[%c1_13, %c0_14, %c0_15] : memref<4x1x128xf32, #tpu.memory_space<vmem>>, vector<1x1x128xf32>
    %20 = vector.shape_cast %19 : vector<1x1x128xf32> to vector<1x128xf32>
    %21 = vector.broadcast %20 : vector<1x128xf32> to vector<8x128xf32>
    %22 = arith.addf %18, %21 : vector<8x128xf32>
    %cst_16 = arith.constant 5.000000e-01 : f32
    %23 = vector.broadcast %cst_16 : f32 to vector<8x128xf32>
    %24 = arith.mulf %23, %22 : vector<8x128xf32>
    %cst_17 = arith.constant 0.707106769 : f32
    %25 = vector.broadcast %cst_17 : f32 to vector<8x128xf32>
    %26 = arith.mulf %22, %25 : vector<8x128xf32>
    %27 = math.erf %26 : vector<8x128xf32>
    %cst_18 = arith.constant 1.000000e+00 : f32
    %28 = vector.broadcast %cst_18 : f32 to vector<8x128xf32>
    %29 = arith.addf %28, %27 : vector<8x128xf32>
    %30 = arith.mulf %24, %29 : vector<8x128xf32>
    %31 = arith.addf %15, %30 : vector<8x128xf32>
    %c2 = arith.constant 2 : index
    %c0_19 = arith.constant 0 : index
    %c0_20 = arith.constant 0 : index
    %32 = vector.load %arg2[%c2, %c0_19, %c0_20] : memref<4x128x128xf32, #tpu.memory_space<vmem>>, vector<1x128x128xf32>
    %33 = vector.shape_cast %32 : vector<1x128x128xf32> to vector<128x128xf32>
    %cst_21 = arith.constant dense<0.000000e+00> : vector<8x128xf32>
    %34 = tpu.matmul %31, %33, %cst_21 {dimension_numbers = #tpu.dot_dimension_numbers<[1], [0], [0], [1], [0, 0, 1, 1], [], []>} : vector<8x128xf32>, vector<128x128xf32>, vector<8x128xf32> -> vector<8x128xf32>
    %c2_22 = arith.constant 2 : index
    %c0_23 = arith.constant 0 : index
    %c0_24 = arith.constant 0 : index
    %35 = vector.load %arg3[%c2_22, %c0_23, %c0_24] : memref<4x1x128xf32, #tpu.memory_space<vmem>>, vector<1x1x128xf32>
    %36 = vector.shape_cast %35 : vector<1x1x128xf32> to vector<1x128xf32>
    %37 = vector.broadcast %36 : vector<1x128xf32> to vector<8x128xf32>
    %38 = arith.addf %34, %37 : vector<8x128xf32>
    %cst_25 = arith.constant 5.000000e-01 : f32
    %39 = vector.broadcast %cst_25 : f32 to vector<8x128xf32>
    %40 = arith.mulf %39, %38 : vector<8x128xf32>
    %cst_26 = arith.constant 0.707106769 : f32
    %41 = vector.broadcast %cst_26 : f32 to vector<8x128xf32>
    %42 = arith.mulf %38, %41 : vector<8x128xf32>
    %43 = math.erf %42 : vector<8x128xf32>
    %cst_27 = arith.constant 1.000000e+00 : f32
    %44 = vector.broadcast %cst_27 : f32 to vector<8x128xf32>
    %45 = arith.addf %44, %43 : vector<8x128xf32>
    %46 = arith.mulf %40, %45 : vector<8x128xf32>
    %47 = arith.addf %31, %46 : vector<8x128xf32>
    %c3 = arith.constant 3 : index
    %c0_28 = arith.constant 0 : index
    %c0_29 = arith.constant 0 : index
    %48 = vector.load %arg2[%c3, %c0_28, %c0_29] : memref<4x128x128xf32, #tpu.memory_space<vmem>>, vector<1x128x128xf32>
    %49 = vector.shape_cast %48 : vector<1x128x128xf32> to vector<128x128xf32>
    %cst_30 = arith.constant dense<0.000000e+00> : vector<8x128xf32>
    %50 = tpu.matmul %47, %49, %cst_30 {dimension_numbers = #tpu.dot_dimension_numbers<[1], [0], [0], [1], [0, 0, 1, 1], [], []>} : vector<8x128xf32>, vector<128x128xf32>, vector<8x128xf32> -> vector<8x128xf32>
    %c3_31 = arith.constant 3 : index
    %c0_32 = arith.constant 0 : index
    %c0_33 = arith.constant 0 : index
    %51 = vector.load %arg3[%c3_31, %c0_32, %c0_33] : memref<4x1x128xf32, #tpu.memory_space<vmem>>, vector<1x1x128xf32>
    %52 = vector.shape_cast %51 : vector<1x1x128xf32> to vector<1x128xf32>
    %53 = vector.broadcast %52 : vector<1x128xf32> to vector<8x128xf32>
    %54 = arith.addf %50, %53 : vector<8x128xf32>
    %c0_34 = arith.constant 0 : index
    %c0_35 = arith.constant 0 : index
    %55 = vector.load %arg4[%c0_34, %c0_35] : memref<8x128xf32, #tpu.memory_space<vmem>>, vector<8x128xf32>
    tpu.vector_store %arg4[%c0_34, %c0_35], %54 {strides = array<i32>} : memref<8x128xf32, #tpu.memory_space<vmem>>, vector<8x128xf32>,
    return
  }
  func.func @transform_0(%arg0: i32) -> (i32, i32) {
    %c0_i32 = arith.constant 0 : i32
    %c0_i32_0 = arith.constant 0 : i32
    return %arg0, %c0_i32 : i32, i32
  }
  func.func @transform_1(%arg0: i32) -> (i32, i32, i32) {
    %c0_i32 = arith.constant 0 : i32
    %c0_i32_0 = arith.constant 0 : i32
    %c0_i32_1 = arith.constant 0 : i32
    %c0_i32_2 = arith.constant 0 : i32
    return %c0_i32, %c0_i32_0, %c0_i32_1 : i32, i32, i32
  }
  func.func @transform_2(%arg0: i32) -> (i32, i32, i32) {
    %c0_i32 = arith.constant 0 : i32
    %c0_i32_0 = arith.constant 0 : i32
    %c0_i32_1 = arith.constant 0 : i32
    %c0_i32_2 = arith.constant 0 : i32
    return %c0_i32, %c0_i32_0, %c0_i32_1 : i32, i32, i32
  }
  func.func @transform_3(%arg0: i32) -> (i32, i32) {
    %c0_i32 = arith.constant 0 : i32
    %c0_i32_0 = arith.constant 0 : i32
    return %arg0, %c0_i32 : i32, i32
  }
}

</mosaic_0001>

<bundles_post_ra>
// kernel: mlp_forward_pallas.1
= control target key start
LH: loop header
LB: loop body
LE: loop exit
PB: predicated region body
PF: predicated region fallthrough
CT: control target
= control target key end

     0   :  { %v819_v3 = vmov 0.0|0.0   ;;  %vm820_vm0 = vmmov 0   ;;  %v821_v6 = vmov 0.0   ;;  %s1102_s0 = inlined_call_operand.vmem [shape: f32[8,128], index: 0, kind: input, shape index: {}]   ;;  %s1103_s1 = inlined_call_operand.vmem [shape: f32[4,128,128], index: 1, kind: input, shape index: {}]   ;;  %s1104_s2 = inlined_call_operand.vmem [shape: f32[4,1,128], index: 2, kind: input, shape index: {}]   ;;  %s1105_s3 = inlined_call_operand.hbm [shape: f32[8,128], index: 3, kind: output, shape index: {}]  }
   0x1   :  { %v16_v0 = vld [vmem:[%s1103_s1] sm:$0xff]  ;;  %v17_v1 = vld [vmem:[%s1103_s1 + $0x8] sm:$0xff]  ;;  %v18_v2 = vld [vmem:[%s1103_s1 + $0x10] sm:$0xff]  ;;  %689 = vmatprep.subr.bf16.mxu0 %v819_v3  ;;  %581 = vmatprep.mubr.msk.f32.mxu0 %vm820_vm0, %v821_v6 }
   0x2   :  { %v690_v4 = vpack.c.bf16 %v17_v1, %v16_v0  ;;  %v19_v5 = vld [vmem:[%s1103_s1 + $0x18] sm:$0xff]  ;;  %713 = vmatprep.subr.bf16.mxu1 %v819_v3  ;;  %616 = vmatprep.mubr.msk.f32.mxu1 %vm820_vm0, %v821_v6  ;;  %v20_v8 = vld [vmem:[%s1103_s1 + $0x20] sm:$0xff]  ;;  %v21_v9 = vld [vmem:[%s1103_s1 + $0x28] sm:$0xff] }
   0x3   :  { %v693_v7 = vpack.c.bf16 %v19_v5, %v18_v2  ;;  %v427_v10 = vld [vmem:[%s1103_s1 + $0x80] sm:$0xff]  ;;  %v428_v11 = vld [vmem:[%s1103_s1 + $0x88] sm:$0xff]  ;;  %v429_v12 = vld [vmem:[%s1103_s1 + $0x90] sm:$0xff]  ;;  %v696_v14 = vpack.c.bf16 %v21_v9, %v20_v8 }
   0x4   :  { %691 = vmatpush3.bf16.msra.mxu0 %v690_v4  ;;  %v430_v13 = vld [vmem:[%s1103_s1 + $0x98] sm:$0xff]  ;;  %v714_v15 = vpack.c.bf16 %v428_v11, %v427_v10  ;;  %v22_v16 = vld [vmem:[%s1103_s1 + $0x30] sm:$0xff] }
   0x5   :  { %692 = vmatprep.subr.bf16.mxu0 %v819_v3  ;;  %v23_v17 = vld [vmem:[%s1103_s1 + $0x38] sm:$0xff] }
   0x8   :  { %694 = vmatpush3.bf16.msra.mxu0 %v693_v7 }
   0x9   :  { %695 = vmatprep.subr.bf16.mxu0 %v819_v3 }
   0xa   :  { %8 = vsyncpa [#allocation3], 0  ;;  %715 = vmatpush3.bf16.msra.mxu1 %v714_v15  ;;  %v717_v18 = vpack.c.bf16 %v430_v13, %v429_v12  ;;  %v431_v19 = vld [vmem:[%s1103_s1 + $0xa0] sm:$0xff]  ;;  %v432_v20 = vld [vmem:[%s1103_s1 + $0xa8] sm:$0xff]  ;;  %v699_v21 = vpack.c.bf16 %v23_v17, %v22_v16 }
   0xb   :  { %716 = vmatprep.subr.bf16.mxu1 %v819_v3  ;;  %v24_v22 = vld [vmem:[%s1103_s1 + $0x40] sm:$0xff]  ;;  %v25_v23 = vld [vmem:[%s1103_s1 + $0x48] sm:$0xff]  ;;  %v720_v24 = vpack.c.bf16 %v432_v20, %v431_v19  ;;  %v26_v26 = vld [vmem:[%s1103_s1 + $0x50] sm:$0xff] }
   0xc   :  { %697 = vmatpush3.bf16.msra.mxu0 %v696_v14  ;;  %v702_v25 = vpack.c.bf16 %v25_v23, %v24_v22  ;;  %v27_v27 = vld [vmem:[%s1103_s1 + $0x58] sm:$0xff]  ;;  %v28_v29 = vld [vmem:[%s1103_s1 + $0x60] sm:$0xff]  ;;  %v29_v30 = vld [vmem:[%s1103_s1 + $0x68] sm:$0xff] }
   0xd   :  { %698 = vmatprep.subr.bf16.mxu0 %v819_v3  ;;  %v705_v28 = vpack.c.bf16 %v27_v27, %v26_v26  ;;  %v708_v31 = vpack.c.bf16 %v29_v30, %v28_v29  ;;  %v30_v32 = vld [vmem:[%s1103_s1 + $0x70] sm:$0xff]  ;;  %v31_v33 = vld [vmem:[%s1103_s1 + $0x78] sm:$0xff]  ;;  %v15_v35 = vld [vmem:[%s1102_s0] sm:$0xff] }
   0xe   :  { %718 = vmatpush3.bf16.msra.mxu1 %v717_v18  ;;  %v711_v34 = vpack.c.bf16 %v31_v33, %v30_v32  ;;  %v433_v36 = vld [vmem:[%s1103_s1 + $0xb0] sm:$0xff]  ;;  %v434_v37 = vld [vmem:[%s1103_s1 + $0xb8] sm:$0xff]  ;;  %v435_v39 = vld [vmem:[%s1103_s1 + $0xc0] sm:$0xff] }
   0xf   :  { %719 = vmatprep.subr.bf16.mxu1 %v819_v3  ;;  %v723_v38 = vpack.c.bf16 %v434_v37, %v433_v36  ;;  %v436_v40 = vld [vmem:[%s1103_s1 + $0xc8] sm:$0xff]  ;;  %v437_v42 = vld [vmem:[%s1103_s1 + $0xd0] sm:$0xff]  ;;  %v438_v43 = vld [vmem:[%s1103_s1 + $0xd8] sm:$0xff] }
  0x10   :  { %700 = vmatpush3.bf16.msra.mxu0 %v699_v21  ;;  %v726_v41 = vpack.c.bf16 %v436_v40, %v435_v39  ;;  %v729_v44 = vpack.c.bf16 %v438_v43, %v437_v42  ;;  %v439_v45 = vld [vmem:[%s1103_s1 + $0xe0] sm:$0xff]  ;;  %v440_v46 = vld [vmem:[%s1103_s1 + $0xe8] sm:$0xff]  ;;  %v441_v48 = vld [vmem:[%s1103_s1 + $0xf0] sm:$0xff] }
  0x11   :  { %701 = vmatprep.subr.bf16.mxu0 %v819_v3  ;;  %v732_v47 = vpack.c.bf16 %v440_v46, %v439_v45  ;;  %v442_v49 = vld [vmem:[%s1103_s1 + $0xf8] sm:$0xff]  ;;  %v445_v51 = vld [vmem:[%s1103_s1 + $0x100] sm:$0xff]  ;;  %v446_v52 = vld [vmem:[%s1103_s1 + $0x108] sm:$0xff] }
  0x12   :  { %721 = vmatpush3.bf16.msra.mxu1 %v720_v24  ;;  %v735_v50 = vpack.c.bf16 %v442_v49, %v441_v48  ;;  %v447_v53 = vld [vmem:[%s1103_s1 + $0x110] sm:$0xff]  ;;  %v738_v54 = vpack.c.bf16 %v446_v52, %v445_v51  ;;  %v448_v55 = vld [vmem:[%s1103_s1 + $0x118] sm:$0xff]  ;;  %v449_v57 = vld [vmem:[%s1103_s1 + $0x120] sm:$0xff] }
  0x13   :  { %722 = vmatprep.subr.bf16.mxu1 %v819_v3  ;;  %v741_v56 = vpack.c.bf16 %v448_v55, %v447_v53  ;;  %v450_v58 = vld [vmem:[%s1103_s1 + $0x128] sm:$0xff]  ;;  %v426_v60 = vld [vmem:[%s1104_s2] ss:$0 sm:$0xff]  ;;  %v451_v7 = vld [vmem:[%s1103_s1 + $0x130] sm:$0xff] }
  0x14   :  { %703 = vmatpush3.bf16.msra.mxu0 %v702_v25  ;;  %v744_v59 = vpack.c.bf16 %v450_v58, %v449_v57  ;;  %v452_v8 = vld [vmem:[%s1103_s1 + $0x138] sm:$0xff]  ;;  %v453_v10 = vld [vmem:[%s1103_s1 + $0x140] sm:$0xff]  ;;  %v455_v12 = vld [vmem:[%s1103_s1 + $0x150] sm:$0xff] }
  0x15   :  { %704 = vmatprep.subr.bf16.mxu0 %v819_v3  ;;  %v747_v9 = vpack.c.bf16 %v452_v8, %v451_v7  ;;  %v456_v13 = vld [vmem:[%s1103_s1 + $0x158] sm:$0xff]  ;;  %v457_v15 = vld [vmem:[%s1103_s1 + $0x160] sm:$0xff]  ;;  %v458_v16 = vld [vmem:[%s1103_s1 + $0x168] sm:$0xff] }
  0x16   :  { %724 = vmatpush3.bf16.msra.mxu1 %v723_v38  ;;  %v753_v14 = vpack.c.bf16 %v456_v13, %v455_v12  ;;  %v756_v17 = vpack.c.bf16 %v458_v16, %v457_v15  ;;  %v459_v18 = vld [vmem:[%s1103_s1 + $0x170] sm:$0xff]  ;;  %v460_v19 = vld [vmem:[%s1103_s1 + $0x178] sm:$0xff]  ;;  %v463_v21 = vld [vmem:[%s1103_s1 + $0x180] sm:$0xff] }
  0x17   :  { %725 = vmatprep.subr.bf16.mxu1 %v819_v3  ;;  %v759_v20 = vpack.c.bf16 %v460_v19, %v459_v18  ;;  %v464_v22 = vld [vmem:[%s1103_s1 + $0x188] sm:$0xff]  ;;  %v465_v23 = vld [vmem:[%s1103_s1 + $0x190] sm:$0xff]  ;;  %v466_v25 = vld [vmem:[%s1103_s1 + $0x198] sm:$0xff] }
  0x18   :  { %706 = vmatpush3.bf16.msra.mxu0 %v705_v28  ;;  %v762_v24 = vpack.c.bf16 %v464_v22, %v463_v21  ;;  %v765_v26 = vpack.c.bf16 %v466_v25, %v465_v23  ;;  %v467_v27 = vld [vmem:[%s1103_s1 + $0x1a0] sm:$0xff]  ;;  %v468_v28 = vld [vmem:[%s1103_s1 + $0x1a8] sm:$0xff]  ;;  %v469_v40 = vld [vmem:[%s1103_s1 + $0x1b0] sm:$0xff] }
  0x19   :  { %707 = vmatprep.subr.bf16.mxu0 %v819_v3  ;;  %v768_v29 = vpack.c.bf16 %v468_v28, %v467_v27  ;;  %v444_v30 = vld [vmem:[%s1104_s2 + $0x1] ss:$0 sm:$0xff]  ;;  %v473_v46 = vld [vmem:[%s1103_s1 + $0x1d0] sm:$0xff]  ;;  %v478_v53 = vld [vmem:[%s1103_s1 + $0x1f8] sm:$0xff] }
  0x1a   :  { %727 = vmatpush3.bf16.msra.mxu1 %v726_v41  ;;  %v470_v41 = vld [vmem:[%s1103_s1 + $0x1b8] sm:$0xff]  ;;  %v471_v43 = vld [vmem:[%s1103_s1 + $0x1c0] sm:$0xff]  ;;  %v477_v52 = vld [vmem:[%s1103_s1 + $0x1f0] sm:$0xff] }
  0x1b   :  { %728 = vmatprep.subr.bf16.mxu1 %v819_v3  ;;  %v771_v42 = vpack.c.bf16 %v470_v41, %v469_v40  ;;  %v475_v49 = vld [vmem:[%s1103_s1 + $0x1e0] sm:$0xff] }
  0x1c   :  { %709 = vmatpush3.bf16.msra.mxu0 %v708_v31  ;;  %v462_v55 = vld [vmem:[%s1104_s2 + $0x2] ss:$0 sm:$0xff] }
  0x1d   :  { %710 = vmatprep.subr.bf16.mxu0 %v819_v3 }
  0x1e   :  { %730 = vmatpush3.bf16.msra.mxu1 %v729_v44  ;;  %v472_v44 = vld [vmem:[%s1103_s1 + $0x1c8] sm:$0xff] }
  0x1f   :  { %731 = vmatprep.subr.bf16.mxu1 %v819_v3  ;;  %v774_v45 = vpack.c.bf16 %v472_v44, %v471_v43 }
  0x20   :  { %712 = vmatpush3.bf16.msra.mxu0 %v711_v34 }
  0x21   :  { %737 = vmatprep.subr.bf16.mxu0 %v819_v3 }
  0x22   :  { %733 = vmatpush3.bf16.msra.mxu1 %v732_v47  ;;  %v474_v47 = vld [vmem:[%s1103_s1 + $0x1d8] sm:$0xff] }
  0x23   :  { %582 = vmatmul.mubr.f32.vlgmr.msra.gmra.mrb[0].mxu0 %v15_v35  ;;  %734 = vmatprep.subr.bf16.mxu1 %v819_v3  ;;  %v777_v48 = vpack.c.bf16 %v474_v47, %v473_v46 }
  0x24   :  { %651 = vmatprep.mubr.msk.f32.mxu0 %vm820_vm0, %v821_v6  ;;  %739 = vmatpush3.bf16.msra.mxu0 %v738_v54  ;;  %v783_v54 = vpack.c.bf16 %v478_v53, %v477_v52 }
  0x25   :  { %740 = vmatprep.subr.bf16.mxu0 %v819_v3 }
  0x26   :  { %736 = vmatpush3.bf16.msra.mxu1 %v735_v50  ;;  %v476_v50 = vld [vmem:[%s1103_s1 + $0x1e8] sm:$0xff] }
  0x27   :  { %761 = vmatprep.subr.bf16.mxu1 %v819_v3  ;;  %v780_v51 = vpack.c.bf16 %v476_v50, %v475_v49 }
  0x28   :  { %742 = vmatpush3.bf16.msra.mxu0 %v741_v56 }
  0x29   :  { %743 = vmatprep.subr.bf16.mxu0 %v819_v3 }
  0x2c   :  { %745 = vmatpush3.bf16.msra.mxu0 %v744_v59 }
  0x2d   :  { %746 = vmatprep.subr.bf16.mxu0 %v819_v3 }
  0x30   :  { %748 = vmatpush3.bf16.msra.mxu0 %v747_v9 }
  0x31   :  { %749 = vmatprep.subr.bf16.mxu0 %v819_v3 }
  0xf6   :  { %v105_v61 = vpop.f32.mrb[0].mxu0 }
  0xf7   :  { %v106_v62 = vadd.f32 %v426_v60, %v105_v61  ;;  %v583_v63 = vpop.f32.mrb[1].mxu0 }
  0xf9   :  { %v110_v0 = vmul.f32 0.70710677, %v106_v62  ;;  %v109_v2 = vmul.f32 0.5, %v106_v62 }
  0xfb   :  { %789 = verf.f32 %v110_v0  ;;  %v480_v0 = vld [vmem:[%s1104_s2 + $0x3] ss:$0 sm:$0xff] }
 0x105   :  { %v790_v1 = vpop.eup %789 }
 0x106   :  { %v112_v4 = vadd.f32 1.0, %v790_v1 }
 0x108   :  { %v113_v5 = vmul.f32 %v112_v4, %v109_v2 }
 0x10a   :  { %617 = vmatmul.mubr.f32.vlgmr.msra.gmra.mrb[0].mxu1 %v113_v5 }
 0x10b   :  { %686 = vmatprep.mubr.msk.f32.mxu1 %vm820_vm0, %v821_v6  ;;  %v454_v6 = vld [vmem:[%s1103_s1 + $0x148] sm:$0xff]  ;;  %763 = vmatpush3.bf16.msra.mxu1 %v762_v24  ;;  %s822_s1 = smov [#allocation2]  }
 0x10c   :  { %v750_v11 = vpack.c.bf16 %v454_v6, %v453_v10  ;;  %764 = vmatprep.subr.bf16.mxu1 %v819_v3  ;;  %s418_s11 = sshll.u32 %s822_s1, 4  ;;  %s419_s11 = int_to_ptr.vmem [resolvable:$true] %s418_s11 }
 0x10d   :  { %s795_s12 = scalar_lea.vmem %s419_s11, 128  ;;  %p800_p1 = scmp.lt.s32.totalorder %s419_s11, %s419_s11 }
 0x10e   :  { %751 = vmatpush3.bf16.msra.mxu0 %v750_v11  ;;  %p796_p0 = scmp.ne.s32.totalorder %s419_s11, %s795_s12  ;;  %p801_p2 = scmp.lt.s32.totalorder %s795_s12, %s795_s12 }
 0x10f   :  { %752 = vmatprep.subr.bf16.mxu0 %v819_v3  ;;  %766 = vmatpush3.bf16.msra.mxu1 %v765_v26 }
 0x110   :  { %767 = vmatprep.subr.bf16.mxu1 %v819_v3  ;;  %p802_p3 = por %p801_p2, %p800_p1 }
 0x112   :  { %754 = vmatpush3.bf16.msra.mxu0 %v753_v14  ;;  %p803_p4 = pnand %p802_p3, %p796_p0 }
 0x113   :  { %755 = vmatprep.subr.bf16.mxu0 %v819_v3  ;;  %769 = vmatpush3.bf16.msra.mxu1 %v768_v29 }
 0x114   :  { %770 = vmatprep.subr.bf16.mxu1 %v819_v3 }
 0x116   :  { %757 = vmatpush3.bf16.msra.mxu0 %v756_v17 }
 0x117   :  { %758 = vmatprep.subr.bf16.mxu0 %v819_v3  ;;  %772 = vmatpush3.bf16.msra.mxu1 %v771_v42 }
 0x118   :  { %773 = vmatprep.subr.bf16.mxu1 %v819_v3 }
 0x11a   :  { %760 = vmatpush3.bf16.msra.mxu0 %v759_v20 }
 0x11b   :  { %775 = vmatpush3.bf16.msra.mxu1 %v774_v45 }
 0x11c   :  { %776 = vmatprep.subr.bf16.mxu1 %v819_v3 }
 0x11f   :  { %778 = vmatpush3.bf16.msra.mxu1 %v777_v48 }
 0x120   :  { %779 = vmatprep.subr.bf16.mxu1 %v819_v3 }
 0x123   :  { %781 = vmatpush3.bf16.msra.mxu1 %v780_v51 }
 0x124   :  { %782 = vmatprep.subr.bf16.mxu1 %v819_v3 }
 0x127   :  { %784 = vmatpush3.bf16.msra.mxu1 %v783_v54 }
 0x1dd   :  { %v205_v31 = vpop.f32.mrb[0].mxu1 }
 0x1de   :  { %v206_v32 = vadd.f32 %v444_v30, %v205_v31  ;;  %v618_v33 = vpop.f32.mrb[1].mxu1 }
 0x1e0   :  { %v210_v34 = vmul.f32 0.70710677, %v206_v32  ;;  %v209_v36 = vmul.f32 0.5, %v206_v32 }
 0x1e2   :  { %791 = verf.f32 %v210_v34 }
 0x1ec   :  { %v792_v35 = vpop.eup %791 }
 0x1ed   :  { %v212_v37 = vadd.f32 1.0, %v792_v35 }
 0x1ef   :  { %v213_v38 = vmul.f32 %v212_v37, %v209_v36 }
 0x1f1   :  { %v214_v39 = vadd.f32 %v213_v38, %v113_v5 }
 0x1f3   :  { %652 = vmatmul.mubr.f32.vlgmr.msra.gmra.mrb[2].mxu0 %v214_v39 }
 0x2c6   :  { %v306_v56 = vpop.f32.mrb[2].mxu0 }
 0x2c7   :  { %v307_v57 = vadd.f32 %v462_v55, %v306_v56  ;;  %v653_v58 = vpop.f32.mrb[3].mxu0 }
 0x2c9   :  { %v311_v59 = vmul.f32 0.70710677, %v307_v57  ;;  %v310_v60 = vmul.f32 0.5, %v307_v57 }
 0x2cb   :  { %793 = verf.f32 %v311_v59 }
 0x2d5   :  { %v794_v3 = vpop.eup %793 }
 0x2d6   :  { %v313_v61 = vadd.f32 1.0, %v794_v3 }
 0x2d8   :  { %v314_v62 = vmul.f32 %v313_v61, %v310_v60 }
 0x2da   :  { %v315_v63 = vadd.f32 %v314_v62, %v214_v39 }
 0x2dc   :  { %687 = vmatmul.mubr.f32.vlgmr.msra.gmra.mrb[2].mxu1 %v315_v63 }
 0x3af   :  { %v407_v1 = vpop.f32.mrb[2].mxu1 }
 0x3b0   :  { %v408_v2 = vadd.f32 %v480_v0, %v407_v1  ;;  %v688_v4 = vpop.f32.mrb[3].mxu1 }
 0x3b2   :  { %411 = vst [vmem:[#allocation2] sm:$0xff] %v408_v2 }
 0x3b3   :  { %806 = shalt.err (!%p803_p4)
}
 0x3b4   :  { %s807_s15 = scalar_lea.hbm %s1105_s3, 128 }
 0x3b5   :  { %p808_p5 = scmp.ne.s32.totalorder %s1105_s3, %s807_s15  ;;  %p811_p6 = scmp.lt.u32.totalorder %s807_s15, %s1105_s3 }
 0x3b7   :  { %p813_p7 = pnand %p811_p6, %p808_p5 }
 0x3b9   :  { %816 = shalt.err (!%p813_p7)
}
 0x3ba   :  { %421 = dma.vmem_to_hbm [thread:$0]  %s419_s11, 128, %s1105_s3, [#allocation3]  }
 0x3bb   :  { %817 = dma.done.wait [#allocation3], 128  }
 0x3bc   :  { %818 = vsyncadd [#allocation3], 4294967168 }
 0x3bd   :  { %425 = vsyncpa [#allocation3], 1 }

</bundles_post_ra>
